<compile_context>
chip_gen: v5e
topology: v5e:2x2
jax: 0.10.0
libtpu: 0.0.40
codegen_flags: <defaults>
</compile_context>

<pallas_src>
import functools

import jax
import jax.numpy as jnp
from jax.experimental import pallas as pl
from jax.experimental.pallas import tpu as pltpu


def _round_up(x: int, m: int) -> int:
    return (x + m - 1) // m * m


def _vmem_limit_bytes() -> int:
    """Generation-aware scoped-VMEM limit (v7x: 64 MiB phys; v5e/v6e: 128 MiB)."""
    cap = 64 * 1024 * 1024  # safe fallback for every generation
    try:
        cap = int(getattr(pltpu.get_tpu_info(), "vmem_capacity_bytes", cap))
    except Exception:
        pass
    # Leave ~25% headroom for compiler-internal scratch; never ask for >100 MiB.
    return int(min(cap - cap // 4, 100 * 1024 * 1024))


def _zs_clip_kernel(x_ref, w_ref, b_ref, txt_ref, logits_ref, feat_ref, acc_ref):
    """Fused: K-tiled linear image-encode -> L2 normalize -> cosine logits.

    x_ref:      (TB, TK)          bf16 flattened-image tile
    w_ref:      (TK, E_pad)       bf16 encoder-weight tile
    b_ref:      (1, E_pad)        f32 encoder bias (VMEM-resident)
    txt_ref:    (E_pad, NC_pad)   bf16 pre-transposed text features (resident)
    logits_ref: (TB, NC_pad)      f32 output logits tile
    feat_ref:   (TB, E_pad)       f32 normalized image-feature tile
    acc_ref:    (TB, E_pad)       f32 accumulator scratch
    """
    k = pl.program_id(1)

    @pl.when(k == 0)
    def _():
        acc_ref[...] = jnp.zeros_like(acc_ref)

    # Encoder matmul partial sum: bf16 inputs, f32 MXU accumulation.
    acc_ref[...] += jnp.dot(
        x_ref[...], w_ref[...], preferred_element_type=jnp.float32
    )

    @pl.when(k == pl.num_programs(1) - 1)
    def _():
        # encode_image finalize: bias add (f32).
        feat = acc_ref[...] + b_ref[...]

        # z / z.norm(dim=-1, keepdim=True)  (padded E columns are zero, so the
        # norm over E_pad equals the norm over E).  Stays f32 on VPU/EUP.
        # No eps, matching PyTorch's z / z.norm() semantics exactly.
        sq = jnp.sum(feat * feat, axis=-1, keepdims=True)
        inv_norm = jax.lax.rsqrt(sq)
        feat_n = feat * inv_norm
        feat_ref[...] = feat_n.astype(feat_ref.dtype)

        # logits = z @ text_features.T  -> text pre-transposed host-side,
        # bf16 operands / f32 accumulation (MXU-native path on all generations).
        logits_ref[...] = jnp.dot(
            feat_n.astype(jnp.bfloat16), txt_ref[...],
            preferred_element_type=jnp.float32,
        ).astype(logits_ref.dtype)


@functools.partial(jax.jit, static_argnames=("tk",))
def zero_shot_clip_forward(image_x, text_features_T, enc_w, enc_b, *, tk=2048):
    """Pallas wrapper reproducing ZeroShotCLIPModule.forward.

    Args:
      image_x:         (B, C, H, W) float32, NCHW like PyTorch.
      text_features_T: (num_classes, E) float32, pre-normalized.
      enc_w:           (C*H*W, E) float32 synthetic image-encoder weight.
      enc_b:           (E,)       float32 synthetic image-encoder bias.
      tk:              K (D_in) contraction tile size (static, multiple of 128).

    Returns:
      (logits_s_ZS (B, num_classes), image_features_z_i (B, E))
    """
    B, C, H, W = image_x.shape
    D_in = C * H * W
    E = enc_w.shape[1]
    NC = text_features_T.shape[0]

    # ---- layout plumbing (host-side): lane-dense padding + pre-transpose ----
    E_pad = _round_up(E, 128)
    NC_pad = _round_up(NC, 128)

    # Batch tiling: bf16 packs (16,128) vregs -> round batch to multiples of 16.
    # Keep tiles big (fewer W re-streams from HBM) but always produce >= 2
    # batch tiles when B allows it, so v7x's second TensorCore gets work.
    B16 = _round_up(B, 16)
    if B16 <= 16:
        tb = B16
    else:
        tb = min(512, _round_up((B16 + 1) // 2, 16))
    B_pad = _round_up(B16, tb)

    # Contraction tiling: large TK amortizes per-grid-step overhead.
    tk = min(tk, _round_up(D_in, 128))
    D_pad = _round_up(D_in, tk)

    x_flat = image_x.reshape(B, D_in)
    x_p = jnp.pad(x_flat, ((0, B_pad - B), (0, D_pad - D_in))).astype(jnp.bfloat16)
    w_p = jnp.pad(enc_w, ((0, D_pad - D_in), (0, E_pad - E))).astype(jnp.bfloat16)
    b_p = jnp.pad(enc_b, (0, E_pad - E)).reshape(1, E_pad).astype(jnp.float32)
    # Zero-padded then transposed once host-side -> (E_pad, NC_pad), bf16 so the
    # resident text matrix is half the VMEM and feeds the MXU natively.  Padded
    # class columns / embedding rows are zero, so padded logits are zero.
    txt_ET = jnp.pad(
        text_features_T, ((0, NC_pad - NC), (0, E_pad - E))
    ).T.astype(jnp.bfloat16)

    grid = (B_pad // tb, D_pad // tk)

    out_shapes = (
        jax.ShapeDtypeStruct((B_pad, NC_pad), jnp.float32),  # logits (padded)
        jax.ShapeDtypeStruct((B_pad, E_pad), jnp.float32),   # features (padded)
    )

    logits_p, feats_p = pl.pallas_call(
        _zs_clip_kernel,
        out_shape=out_shapes,
        grid_spec=pltpu.PrefetchScalarGridSpec(
            num_scalar_prefetch=0,
            grid=grid,
            in_specs=[
                pl.BlockSpec((tb, tk), lambda b, k: (b, k)),        # x tile
                pl.BlockSpec((tk, E_pad), lambda b, k: (k, 0)),     # W tile
                pl.BlockSpec((1, E_pad), lambda b, k: (0, 0)),      # bias (resident)
                pl.BlockSpec((E_pad, NC_pad), lambda b, k: (0, 0)), # text (resident)
            ],
            out_specs=(
                pl.BlockSpec((tb, NC_pad), lambda b, k: (b, 0)),
                pl.BlockSpec((tb, E_pad), lambda b, k: (b, 0)),
            ),
            scratch_shapes=[pltpu.VMEM((tb, E_pad), jnp.float32)],
        ),
        compiler_params=pltpu.CompilerParams(
            dimension_semantics=("parallel", "arbitrary"),
            vmem_limit_bytes=_vmem_limit_bytes(),
        ),
    )(x_p, w_p, b_p, txt_ET)

    # Strip padding back to the module's output contract.
    return logits_p[:B, :NC], feats_p[:B, :E]


if __name__ == "__main__":
    # Small shapes consistent with the module's forward contract.
    B, C, H, W = 2, 4, 16, 16        # image batch (NCHW)
    E = 32                           # embedding_dim
    NUM_CLASSES = 8                  # num_classes
    D_IN = C * H * W

    key = jax.random.PRNGKey(0)
    k_img, k_txt, k_w, k_b = jax.random.split(key, 4)

    image_x = jax.random.normal(k_img, (B, C, H, W), dtype=jnp.float32)

    # Pre-computed, *normalized* text features (as the module expects).
    txt_raw = jax.random.normal(k_txt, (NUM_CLASSES, E), dtype=jnp.float32)
    text_features_T = txt_raw / jnp.linalg.norm(txt_raw, axis=-1, keepdims=True)

    # Deterministic synthetic CLIP image-encoder parameters.
    enc_w = jax.random.normal(k_w, (D_IN, E), dtype=jnp.float32) * 0.02
    enc_b = jax.random.normal(k_b, (E,), dtype=jnp.float32) * 0.02

    logits, feats = zero_shot_clip_forward(image_x, text_features_T, enc_w, enc_b)
    jax.block_until_ready((logits, feats))

    # Pure-JAX reference following the same dtype path as the kernel
    # (bf16 operands / f32 accumulation on both matmuls, f32 normalize).
    x_bf = image_x.reshape(B, D_IN).astype(jnp.bfloat16)
    w_bf = enc_w.astype(jnp.bfloat16)
    ref_feat = jnp.dot(x_bf, w_bf, preferred_element_type=jnp.float32) + enc_b
    ref_feat = ref_feat / jnp.linalg.norm(ref_feat, axis=-1, keepdims=True)
    ref_logits = jnp.dot(
        ref_feat.astype(jnp.bfloat16),
        text_features_T.T.astype(jnp.bfloat16),
        preferred_element_type=jnp.float32,
    )
    # Full-f32 module semantics (looser tolerance: bf16 text/feat rounding).
    ref_logits_f32 = ref_feat @ text_features_T.T

    assert logits.shape == (B, NUM_CLASSES)
    assert feats.shape == (B, E)
    assert jnp.allclose(feats, ref_feat, atol=2e-3, rtol=2e-3)
    assert jnp.allclose(logits, ref_logits, atol=2e-3, rtol=2e-3)
    assert jnp.allclose(logits, ref_logits_f32, atol=2e-2, rtol=2e-2)

    print("KERNEL_OK")
</pallas_src>

<mosaic_0001>
module attributes {stable_mosaic.version = 11 : i64} {
  func.func @_zs_clip_kernel(%arg0: i32, %arg1: i32, %arg2: memref<16x1024xbf16, #tpu.memory_space<vmem>>, %arg3: memref<1024x128xbf16, #tpu.memory_space<vmem>>, %arg4: memref<1x128xf32, #tpu.memory_space<vmem>>, %arg5: memref<128x128xbf16, #tpu.memory_space<vmem>>, %arg6: memref<16x128xf32, #tpu.memory_space<vmem>>, %arg7: memref<16x128xf32, #tpu.memory_space<vmem>>, %arg8: memref<16x128xf32, #tpu.memory_space<vmem>>) attributes {dimension_semantics = [#tpu.dimension_semantics<parallel>, #tpu.dimension_semantics<arbitrary>], iteration_bounds = array<i64: 1, 1>, scalar_prefetch = 0 : i64, scratch_operands = 1 : i64, tpu.core_type = #tpu.core_type<tc>, window_params = [{transform_indices = @transform_0, window_bounds = array<i64: 16, 1024>}, {transform_indices = @transform_1, window_bounds = array<i64: 1024, 128>}, {pipeline_mode = #tpu.pipeline_mode<synchronous>, transform_indices = @transform_2, window_bounds = array<i64: 1, 128>}, {pipeline_mode = #tpu.pipeline_mode<synchronous>, transform_indices = @transform_3, window_bounds = array<i64: 128, 128>}, {transform_indices = @transform_4, window_bounds = array<i64: 16, 128>}, {transform_indices = @transform_5, window_bounds = array<i64: 16, 128>}]} {
    %c0_i32 = arith.constant 0 : i32
    %0 = arith.cmpi eq, %arg1, %c0_i32 : i32
    %1 = arith.extui %0 : i1 to i32
    %c0_i32_0 = arith.constant 0 : i32
    %2 = arith.cmpi ne, %1, %c0_i32_0 : i32
    scf.if %2 {
      %cst_10 = arith.constant 0.000000e+00 : f32
      %12 = vector.broadcast %cst_10 : f32 to vector<16x128xf32>
      %c0_11 = arith.constant 0 : index
      %c0_12 = arith.constant 0 : index
      %13 = vector.load %arg8[%c0_11, %c0_12] : memref<16x128xf32, #tpu.memory_space<vmem>>, vector<16x128xf32>
      tpu.vector_store %arg8[%c0_11, %c0_12], %12 {strides = array<i32>} : memref<16x128xf32, #tpu.memory_space<vmem>>, vector<16x128xf32>,
    } else {
    }
    %c0 = arith.constant 0 : index
    %c0_1 = arith.constant 0 : index
    %3 = vector.load %arg8[%c0, %c0_1] : memref<16x128xf32, #tpu.memory_space<vmem>>, vector<16x128xf32>
    %c0_2 = arith.constant 0 : index
    %c0_3 = arith.constant 0 : index
    %4 = vector.load %arg2[%c0_2, %c0_3] : memref<16x1024xbf16, #tpu.memory_space<vmem>>, vector<16x1024xbf16>
    %c0_4 = arith.constant 0 : index
    %c0_5 = arith.constant 0 : index
    %5 = vector.load %arg3[%c0_4, %c0_5] : memref<1024x128xbf16, #tpu.memory_space<vmem>>, vector<1024x128xbf16>
    %cst = arith.constant dense<0.000000e+00> : vector<16x128xf32>
    %6 = tpu.matmul %4, %5, %cst {dimension_numbers = #tpu.dot_dimension_numbers<[1], [0], [0], [1], [0, 0, 1, 1], [], []>} : vector<16x1024xbf16>, vector<1024x128xbf16>, vector<16x128xf32> -> vector<16x128xf32>
    %7 = arith.addf %3, %6 : vector<16x128xf32>
    %c0_6 = arith.constant 0 : index
    %c0_7 = arith.constant 0 : index
    %8 = vector.load %arg8[%c0_6, %c0_7] : memref<16x128xf32, #tpu.memory_space<vmem>>, vector<16x128xf32>
    tpu.vector_store %arg8[%c0_6, %c0_7], %7 {strides = array<i32>} : memref<16x128xf32, #tpu.memory_space<vmem>>, vector<16x128xf32>,
    %c0_i32_8 = arith.constant 0 : i32
    %9 = arith.cmpi eq, %arg1, %c0_i32_8 : i32
    %10 = arith.extui %9 : i1 to i32
    %c0_i32_9 = arith.constant 0 : i32
    %11 = arith.cmpi ne, %10, %c0_i32_9 : i32
    scf.if %11 {
      %c0_10 = arith.constant 0 : index
      %c0_11 = arith.constant 0 : index
      %12 = vector.load %arg8[%c0_10, %c0_11] : memref<16x128xf32, #tpu.memory_space<vmem>>, vector<16x128xf32>
      %c0_12 = arith.constant 0 : index
      %c0_13 = arith.constant 0 : index
      %13 = vector.load %arg4[%c0_12, %c0_13] : memref<1x128xf32, #tpu.memory_space<vmem>>, vector<1x128xf32>
      %14 = vector.broadcast %13 : vector<1x128xf32> to vector<16x128xf32>
      %15 = arith.addf %12, %14 : vector<16x128xf32>
      %16 = arith.mulf %15, %15 : vector<16x128xf32>
      %cst_14 = arith.constant dense<0.000000e+00> : vector<16xf32>
      %17 = vector.multi_reduction <add>, %16, %cst_14 [1] : vector<16x128xf32> to vector<16xf32>
      %18 = vector.shape_cast %17 : vector<16xf32> to vector<16x1xf32>
      %19 = math.rsqrt %18 : vector<16x1xf32>
      %20 = vector.broadcast %19 : vector<16x1xf32> to vector<16x128xf32>
      %21 = arith.mulf %15, %20 : vector<16x128xf32>
      %c0_15 = arith.constant 0 : index
      %c0_16 = arith.constant 0 : index
      %22 = vector.load %arg7[%c0_15, %c0_16] : memref<16x128xf32, #tpu.memory_space<vmem>>, vector<16x128xf32>
      tpu.vector_store %arg7[%c0_15, %c0_16], %21 {strides = array<i32>} : memref<16x128xf32, #tpu.memory_space<vmem>>, vector<16x128xf32>,
      %23 = arith.truncf %21 : vector<16x128xf32> to vector<16x128xbf16>
      %c0_17 = arith.constant 0 : index
      %c0_18 = arith.constant 0 : index
      %24 = vector.load %arg5[%c0_17, %c0_18] : memref<128x128xbf16, #tpu.memory_space<vmem>>, vector<128x128xbf16>
      %cst_19 = arith.constant dense<0.000000e+00> : vector<16x128xf32>
      %25 = tpu.matmul %23, %24, %cst_19 {dimension_numbers = #tpu.dot_dimension_numbers<[1], [0], [0], [1], [0, 0, 1, 1], [], []>} : vector<16x128xbf16>, vector<128x128xbf16>, vector<16x128xf32> -> vector<16x128xf32>
      %c0_20 = arith.constant 0 : index
      %c0_21 = arith.constant 0 : index
      %26 = vector.load %arg6[%c0_20, %c0_21] : memref<16x128xf32, #tpu.memory_space<vmem>>, vector<16x128xf32>
      tpu.vector_store %arg6[%c0_20, %c0_21], %25 {strides = array<i32>} : memref<16x128xf32, #tpu.memory_space<vmem>>, vector<16x128xf32>,
    } else {
    }
    return
  }
  func.func @transform_0(%arg0: i32, %arg1: i32) -> (i32, i32) {
    %c0_i32 = arith.constant 0 : i32
    return %arg0, %arg1 : i32, i32
  }
  func.func @transform_1(%arg0: i32, %arg1: i32) -> (i32, i32) {
    %c0_i32 = arith.constant 0 : i32
    %c0_i32_0 = arith.constant 0 : i32
    return %arg1, %c0_i32 : i32, i32
  }
  func.func @transform_2(%arg0: i32, %arg1: i32) -> (i32, i32) {
    %c0_i32 = arith.constant 0 : i32
    %c0_i32_0 = arith.constant 0 : i32
    %c0_i32_1 = arith.constant 0 : i32
    return %c0_i32, %c0_i32_0 : i32, i32
  }
  func.func @transform_3(%arg0: i32, %arg1: i32) -> (i32, i32) {
    %c0_i32 = arith.constant 0 : i32
    %c0_i32_0 = arith.constant 0 : i32
    %c0_i32_1 = arith.constant 0 : i32
    return %c0_i32, %c0_i32_0 : i32, i32
  }
  func.func @transform_4(%arg0: i32, %arg1: i32) -> (i32, i32) {
    %c0_i32 = arith.constant 0 : i32
    %c0_i32_0 = arith.constant 0 : i32
    return %arg0, %c0_i32 : i32, i32
  }
  func.func @transform_5(%arg0: i32, %arg1: i32) -> (i32, i32) {
    %c0_i32 = arith.constant 0 : i32
    %c0_i32_0 = arith.constant 0 : i32
    return %arg0, %c0_i32 : i32, i32
  }
}

</mosaic_0001>

<bundles_post_ra>
// kernel: zero_shot_clip_forward.1
= control target key start
LH: loop header
LB: loop body
LE: loop exit
PB: predicated region body
PF: predicated region fallthrough
CT: control target
= control target key end

     0   :  { %s1547_s1 = inlined_call_operand.vmem [shape: bf16[1024,128], index: 1, kind: input, shape index: {}]   ;;  %s1548_s0 = inlined_call_operand.vmem [shape: bf16[16,1024], index: 0, kind: input, shape index: {}]   ;;  %s1549_s2 = inlined_call_operand.vmem [shape: f32[1,128], index: 2, kind: input, shape index: {}]   ;;  %s1550_s3 = inlined_call_operand.vmem [shape: bf16[128,128], index: 3, kind: input, shape index: {}]   ;;  %s1551_s5 = inlined_call_operand.vmem [shape: f32[16,128], index: 5, kind: output, shape index: {1}]   ;;  %s1552_s4 = inlined_call_operand.vmem [shape: f32[16,128], index: 4, kind: output, shape index: {0}]  }
   0x1   :  { %v1168_v0 = vld [vmem:[%s1547_s1 + $0x38] sm:$0xff]  ;;  %v1167_v4 = vld [vmem:[%s1547_s1 + $0x30] sm:$0xff]  ;;  %v1166_v8 = vld [vmem:[%s1547_s1 + $0x28] sm:$0xff] }
   0x2   :  { %v1176_v1 = vld [vmem:[%s1547_s1 + $0x78] sm:$0xff]  ;;  %587 = vmatpush.bf16.msra.mxu0 %v1168_v0  ;;  %v1175_v5 = vld [vmem:[%s1547_s1 + $0x70] sm:$0xff]  ;;  %v1174_v9 = vld [vmem:[%s1547_s1 + $0x68] sm:$0xff] }
   0x3   :  { %v1184_v2 = vld [vmem:[%s1547_s1 + $0xb8] sm:$0xff]  ;;  %601 = vmatpush.bf16.msra.mxu1 %v1176_v1  ;;  %v1183_v6 = vld [vmem:[%s1547_s1 + $0xb0] sm:$0xff]  ;;  %v1182_v10 = vld [vmem:[%s1547_s1 + $0xa8] sm:$0xff] }
   0x4   :  { %v1192_v3 = vld [vmem:[%s1547_s1 + $0xf8] sm:$0xff]  ;;  %615 = vmatpush.bf16.msra.mxu2 %v1184_v2  ;;  %v1191_v7 = vld [vmem:[%s1547_s1 + $0xf0] sm:$0xff]  ;;  %v1190_v11 = vld [vmem:[%s1547_s1 + $0xe8] sm:$0xff] }
   0x5   :  { %629 = vmatpush.bf16.msra.mxu3 %v1192_v3  ;;  %v1165_v12 = vld [vmem:[%s1547_s1 + $0x20] sm:$0xff]  ;;  %v1164_v16 = vld [vmem:[%s1547_s1 + $0x18] sm:$0xff]  ;;  %v1163_v20 = vld [vmem:[%s1547_s1 + $0x10] sm:$0xff] }
   0x6   :  { %588 = vmatpush.bf16.msra.mxu0 %v1167_v4  ;;  %v1173_v13 = vld [vmem:[%s1547_s1 + $0x60] sm:$0xff]  ;;  %v1172_v17 = vld [vmem:[%s1547_s1 + $0x58] sm:$0xff]  ;;  %v1171_v21 = vld [vmem:[%s1547_s1 + $0x50] sm:$0xff] }
   0x7   :  { %602 = vmatpush.bf16.msra.mxu1 %v1175_v5  ;;  %v1181_v14 = vld [vmem:[%s1547_s1 + $0xa0] sm:$0xff]  ;;  %v1180_v18 = vld [vmem:[%s1547_s1 + $0x98] sm:$0xff]  ;;  %v1179_v22 = vld [vmem:[%s1547_s1 + $0x90] sm:$0xff] }
   0x8   :  { %616 = vmatpush.bf16.msra.mxu2 %v1183_v6  ;;  %v1189_v15 = vld [vmem:[%s1547_s1 + $0xe0] sm:$0xff]  ;;  %v1188_v19 = vld [vmem:[%s1547_s1 + $0xd8] sm:$0xff]  ;;  %v1187_v23 = vld [vmem:[%s1547_s1 + $0xd0] sm:$0xff] }
   0x9   :  { %630 = vmatpush.bf16.msra.mxu3 %v1191_v7  ;;  %v1162_v24 = vld [vmem:[%s1547_s1 + $0x8] sm:$0xff]  ;;  %v1161_v28 = vld [vmem:[%s1547_s1] sm:$0xff]  ;;  %v1200_v32 = vld [vmem:[%s1547_s1 + $0x138] sm:$0xff] }
   0xa   :  { %589 = vmatpush.bf16.msra.mxu0 %v1166_v8  ;;  %v1170_v25 = vld [vmem:[%s1547_s1 + $0x48] sm:$0xff]  ;;  %v1169_v29 = vld [vmem:[%s1547_s1 + $0x40] sm:$0xff]  ;;  %v1208_v33 = vld [vmem:[%s1547_s1 + $0x178] sm:$0xff] }
   0xb   :  { %603 = vmatpush.bf16.msra.mxu1 %v1174_v9  ;;  %v1178_v26 = vld [vmem:[%s1547_s1 + $0x88] sm:$0xff]  ;;  %v1177_v30 = vld [vmem:[%s1547_s1 + $0x80] sm:$0xff]  ;;  %v1216_v42 = vld [vmem:[%s1547_s1 + $0x1b8] sm:$0xff] }
   0xc   :  { %617 = vmatpush.bf16.msra.mxu2 %v1182_v10  ;;  %v1186_v27 = vld [vmem:[%s1547_s1 + $0xc8] sm:$0xff]  ;;  %v1185_v31 = vld [vmem:[%s1547_s1 + $0xc0] sm:$0xff]  ;;  %v1224_v43 = vld [vmem:[%s1547_s1 + $0x1f8] sm:$0xff] }
   0xd   :  { %631 = vmatpush.bf16.msra.mxu3 %v1190_v11  ;;  %v843_v34 = vld [vmem:[%s1548_s0 + $0x8] sm:$0xf]  ;;  %v1154_v36 = vld [vmem:[%s1548_s0 + $0xc] sm:$0xf]  ;;  %v835_v38 = vld [vmem:[%s1548_s0] sm:$0xf] }
   0xe   :  { %590 = vmatpush.bf16.msra.mxu0 %v1165_v12  ;;  %v1158_v35 = vld [vmem:[%s1548_s0 + $0x24] sm:$0xf0]  ;;  %v845_v37 = vld [vmem:[%s1548_s0 + $0x28] sm:$0xf0]  ;;  %v1157_v39 = vld [vmem:[%s1548_s0 + $0x1c] sm:$0xf0] }
   0xf   :  { %604 = vmatpush.bf16.msra.mxu1 %v1173_v13  ;;  %v1153_v40 = vld [vmem:[%s1548_s0 + $0x4] sm:$0xf]  ;;  %v844_v44 = vor.u32 %v1158_v35, %v843_v34  ;;  %v848_v45 = vor.u32 %v1154_v36, %v845_v37  ;;  %v836_v46 = vor.u32 %v1157_v39, %v835_v38  ;;  %v1199_v48 = vld [vmem:[%s1547_s1 + $0x130] sm:$0xff]  ;;  %v1198_v52 = vld [vmem:[%s1547_s1 + $0x128] sm:$0xff] }
  0x10   :  { %618 = vmatpush.bf16.msra.mxu2 %v1181_v14  ;;  %v837_v41 = vld [vmem:[%s1548_s0 + $0x20] sm:$0xf0]  ;;  %v1207_v49 = vld [vmem:[%s1547_s1 + $0x170] sm:$0xff]  ;;  %v1206_v53 = vld [vmem:[%s1547_s1 + $0x168] sm:$0xff] }
  0x11   :  { %632 = vmatpush.bf16.msra.mxu3 %v1189_v15  ;;  %v840_v47 = vor.u32 %v1153_v40, %v837_v41  ;;  %v1215_v50 = vld [vmem:[%s1547_s1 + $0x1b0] sm:$0xff]  ;;  %v1214_v54 = vld [vmem:[%s1547_s1 + $0x1a8] sm:$0xff]  ;;  %v1197_v56 = vld [vmem:[%s1547_s1 + $0x120] sm:$0xff] }
  0x12   :  { %591 = vmatpush.bf16.msra.mxu0 %v1164_v16  ;;  %v1223_v51 = vld [vmem:[%s1547_s1 + $0x1f0] sm:$0xff]  ;;  %v1222_v55 = vld [vmem:[%s1547_s1 + $0x1e8] sm:$0xff]  ;;  %v1205_v57 = vld [vmem:[%s1547_s1 + $0x160] sm:$0xff] }
  0x13   :  { %605 = vmatpush.bf16.msra.mxu1 %v1172_v17  ;;  %v1213_v58 = vld [vmem:[%s1547_s1 + $0x1a0] sm:$0xff]  ;;  %v1196_v60 = vld [vmem:[%s1547_s1 + $0x118] sm:$0xff]  ;;  %v1195_v0 = vld [vmem:[%s1547_s1 + $0x110] sm:$0xff] }
  0x14   :  { %619 = vmatpush.bf16.msra.mxu2 %v1180_v18  ;;  %v1221_v59 = vld [vmem:[%s1547_s1 + $0x1e0] sm:$0xff]  ;;  %v1204_v61 = vld [vmem:[%s1547_s1 + $0x158] sm:$0xff]  ;;  %v1203_v1 = vld [vmem:[%s1547_s1 + $0x150] sm:$0xff] }
  0x15   :  { %633 = vmatpush.bf16.msra.mxu3 %v1188_v19  ;;  %v1212_v62 = vld [vmem:[%s1547_s1 + $0x198] sm:$0xff]  ;;  %v1211_v2 = vld [vmem:[%s1547_s1 + $0x190] sm:$0xff]  ;;  %v1194_v4 = vld [vmem:[%s1547_s1 + $0x108] sm:$0xff] }
  0x16   :  { %592 = vmatpush.bf16.msra.mxu0 %v1163_v20  ;;  %v1220_v63 = vld [vmem:[%s1547_s1 + $0x1d8] sm:$0xff]  ;;  %v1219_v3 = vld [vmem:[%s1547_s1 + $0x1d0] sm:$0xff]  ;;  %v1202_v5 = vld [vmem:[%s1547_s1 + $0x148] sm:$0xff] }
  0x17   :  { %606 = vmatpush.bf16.msra.mxu1 %v1171_v21  ;;  %v1210_v6 = vld [vmem:[%s1547_s1 + $0x188] sm:$0xff]  ;;  %v1193_v8 = vld [vmem:[%s1547_s1 + $0x100] sm:$0xff]  ;;  %v851_v12 = vld [vmem:[%s1548_s0 + $0x10] sm:$0xf] }
  0x18   :  { %620 = vmatpush.bf16.msra.mxu2 %v1179_v22  ;;  %v1218_v7 = vld [vmem:[%s1547_s1 + $0x1c8] sm:$0xff]  ;;  %v1201_v9 = vld [vmem:[%s1547_s1 + $0x140] sm:$0xff]  ;;  %v1159_v13 = vld [vmem:[%s1548_s0 + $0x2c] sm:$0xf0] }
  0x19   :  { %634 = vmatpush.bf16.msra.mxu3 %v1187_v23  ;;  %v1209_v10 = vld [vmem:[%s1547_s1 + $0x180] sm:$0xff]  ;;  %v1155_v14 = vld [vmem:[%s1548_s0 + $0x14] sm:$0xf]  ;;  %v859_v16 = vld [vmem:[%s1548_s0 + $0x18] sm:$0xf]  ;;  %v852_v20 = vor.u32 %v1159_v13, %v851_v12 }
  0x1a   :  { %593 = vmatpush.bf16.msra.mxu0 %v1162_v24  ;;  %v1217_v11 = vld [vmem:[%s1547_s1 + $0x1c0] sm:$0xff]  ;;  %v853_v15 = vld [vmem:[%s1548_s0 + $0x30] sm:$0xf0]  ;;  %v1160_v17 = vld [vmem:[%s1548_s0 + $0x34] sm:$0xf0] }
  0x1b   :  { %607 = vmatpush.bf16.msra.mxu1 %v1170_v25  ;;  %v1156_v18 = vld [vmem:[%s1548_s0 + $0x1c] sm:$0xf]  ;;  %v856_v21 = vor.u32 %v1155_v14, %v853_v15  ;;  %v860_v22 = vor.u32 %v1160_v17, %v859_v16 }
  0x1c   :  { %621 = vmatpush.bf16.msra.mxu2 %v1178_v26  ;;  %v861_v19 = vld [vmem:[%s1548_s0 + $0x38] sm:$0xf0] }
  0x1d   :  { %635 = vmatpush.bf16.msra.mxu3 %v1186_v27  ;;  %v864_v23 = vor.u32 %v1156_v18, %v861_v19 }
  0x1e   :  { %594 = vmatpush.bf16.msra.mxu0 %v1161_v28 }
  0x1f   :  { %608 = vmatpush.bf16.msra.mxu1 %v1169_v29 }
  0x20   :  { %622 = vmatpush.bf16.msra.mxu2 %v1177_v30  ;;  %v1232_v30 = vld [vmem:[%s1550_s3 + $0x38] sm:$0xff] }
  0x21   :  { %636 = vmatpush.bf16.msra.mxu3 %v1185_v31  ;;  %595 = vmatmul.bf16.vlgmr.msra.gmra.mxu0 %v836_v46 }
  0x22   :  { %643 = vmatpush.bf16.msrb.mxu0 %v1200_v32  ;;  %609 = vmatmul.bf16.vlgmr.msra.gmra.mxu1 %v840_v47  ;;  %v1233_v47 = vld [vmem:[%s1549_s2] ss:$0 sm:$0xff] }
  0x23   :  { %657 = vmatpush.bf16.msrb.mxu1 %v1208_v33  ;;  %623 = vmatmul.bf16.vlgmr.msra.gmra.mxu2 %v844_v44 }
  0x24   :  { %671 = vmatpush.bf16.msrb.mxu2 %v1216_v42  ;;  %637 = vmatmul.bf16.vlgmr.msra.gmra.mxu3 %v848_v45 }
  0x25   :  { %685 = vmatpush.bf16.msrb.mxu3 %v1224_v43 }
  0x26   :  { %644 = vmatpush.bf16.msrb.mxu0 %v1199_v48 }
  0x27   :  { %658 = vmatpush.bf16.msrb.mxu1 %v1207_v49 }
  0x28   :  { %672 = vmatpush.bf16.msrb.mxu2 %v1215_v50 }
  0x29   :  { %686 = vmatpush.bf16.msrb.mxu3 %v1223_v51 }
  0x2a   :  { %645 = vmatpush.bf16.msrb.mxu0 %v1198_v52 }
  0x2b   :  { %659 = vmatpush.bf16.msrb.mxu1 %v1206_v53 }
  0x2c   :  { %673 = vmatpush.bf16.msrb.mxu2 %v1214_v54 }
  0x2d   :  { %687 = vmatpush.bf16.msrb.mxu3 %v1222_v55 }
  0x2e   :  { %646 = vmatpush.bf16.msrb.mxu0 %v1197_v56 }
  0x2f   :  { %660 = vmatpush.bf16.msrb.mxu1 %v1205_v57 }
  0x30   :  { %674 = vmatpush.bf16.msrb.mxu2 %v1213_v58 }
  0x31   :  { %688 = vmatpush.bf16.msrb.mxu3 %v1221_v59 }
  0x32   :  { %647 = vmatpush.bf16.msrb.mxu0 %v1196_v60  ;;  %v1231_v60 = vld [vmem:[%s1550_s3 + $0x30] sm:$0xff] }
  0x33   :  { %661 = vmatpush.bf16.msrb.mxu1 %v1204_v61  ;;  %v1230_v61 = vld [vmem:[%s1550_s3 + $0x28] sm:$0xff] }
  0x34   :  { %675 = vmatpush.bf16.msrb.mxu2 %v1212_v62  ;;  %v1229_v62 = vld [vmem:[%s1550_s3 + $0x20] sm:$0xff] }
  0x35   :  { %689 = vmatpush.bf16.msrb.mxu3 %v1220_v63  ;;  %v1228_v63 = vld [vmem:[%s1550_s3 + $0x18] sm:$0xff] }
  0x36   :  { %648 = vmatpush.bf16.msrb.mxu0 %v1195_v0  ;;  %v1227_v0 = vld [vmem:[%s1550_s3 + $0x10] sm:$0xff] }
  0x37   :  { %662 = vmatpush.bf16.msrb.mxu1 %v1203_v1  ;;  %v1226_v1 = vld [vmem:[%s1550_s3 + $0x8] sm:$0xff] }
  0x38   :  { %676 = vmatpush.bf16.msrb.mxu2 %v1211_v2  ;;  %v1225_v2 = vld [vmem:[%s1550_s3] sm:$0xff] }
  0x39   :  { %690 = vmatpush.bf16.msrb.mxu3 %v1219_v3 }
  0x3a   :  { %649 = vmatpush.bf16.msrb.mxu0 %v1194_v4 }
  0x3b   :  { %663 = vmatpush.bf16.msrb.mxu1 %v1202_v5 }
  0x3c   :  { %677 = vmatpush.bf16.msrb.mxu2 %v1210_v6 }
  0x3d   :  { %691 = vmatpush.bf16.msrb.mxu3 %v1218_v7 }
  0x3e   :  { %650 = vmatpush.bf16.msrb.mxu0 %v1193_v8 }
  0x3f   :  { %664 = vmatpush.bf16.msrb.mxu1 %v1201_v9 }
  0x40   :  { %678 = vmatpush.bf16.msrb.mxu2 %v1209_v10 }
  0x41   :  { %692 = vmatpush.bf16.msrb.mxu3 %v1217_v11  ;;  %651 = vmatmul.bf16.vlgmr.msrb.gmra.mxu0 %v852_v20 }
  0x42   :  { %665 = vmatmul.bf16.vlgmr.msrb.gmra.mxu1 %v856_v21  ;;  %809 = vmatpush.bf16.msra.mxu0 %v1232_v30 }
  0x43   :  { %679 = vmatmul.bf16.vlgmr.msrb.gmra.mxu2 %v860_v22 }
  0x44   :  { %693 = vmatmul.bf16.vlgmr.msrb.gmra.mxu3 %v864_v23 }
  0x46   :  { %810 = vmatpush.bf16.msra.mxu0 %v1231_v60 }
  0x4a   :  { %811 = vmatpush.bf16.msra.mxu0 %v1230_v61 }
  0x4e   :  { %812 = vmatpush.bf16.msra.mxu0 %v1229_v62 }
  0x52   :  { %813 = vmatpush.bf16.msra.mxu0 %v1228_v63 }
  0x56   :  { %814 = vmatpush.bf16.msra.mxu0 %v1227_v0 }
  0x5a   :  { %815 = vmatpush.bf16.msra.mxu0 %v1226_v1 }
  0x5e   :  { %816 = vmatpush.bf16.msra.mxu0 %v1225_v2 }
  0x9e   :  { %v596_v24 = vpop.f32.mrf.mxu0 }
  0x9f   :  { %v610_v25 = vpop.f32.mrf.mxu1 }
  0xa0   :  { %v611_v28 = vadd.f32 %v610_v25, %v596_v24 }
  0xa6   :  { %v624_v26 = vpop.f32.mrf.mxu2  ;;  %v598_v29 = vpop.f32.mrf.mxu0 }
  0xa7   :  { %v638_v27 = vpop.f32.mrf.mxu3  ;;  %v612_v31 = vpop.f32.mrf.mxu1  ;;  %v625_v32 = vadd.f32 %v624_v26, %v611_v28 }
  0xa8   :  { %v613_v36 = vadd.f32 %v612_v31, %v598_v29 }
  0xa9   :  { %v639_v35 = vadd.f32 %v638_v27, %v625_v32 }
  0xae   :  { %v626_v33 = vpop.f32.mrf.mxu2 }
  0xaf   :  { %v640_v34 = vpop.f32.mrf.mxu3  ;;  %v627_v40 = vadd.f32 %v626_v33, %v613_v36 }
  0xb1   :  { %v641_v44 = vadd.f32 %v640_v34, %v627_v40 }
  0xbe   :  { %v652_v37 = vpop.f32.mrf.mxu0 }
  0xbf   :  { %v653_v38 = vadd.f32 %v652_v37, %v639_v35  ;;  %v666_v39 = vpop.f32.mrf.mxu1 }
  0xc1   :  { %v667_v41 = vadd.f32 %v666_v39, %v653_v38 }
  0xc6   :  { %v680_v42 = vpop.f32.mrf.mxu2  ;;  %v654_v46 = vpop.f32.mrf.mxu0 }
  0xc7   :  { %v694_v43 = vpop.f32.mrf.mxu3  ;;  %v681_v45 = vadd.f32 %v680_v42, %v667_v41  ;;  %v655_v49 = vadd.f32 %v654_v46, %v641_v44  ;;  %v668_v51 = vpop.f32.mrf.mxu1 }
  0xc9   :  { %v695_v48 = vadd.f32 %v694_v43, %v681_v45  ;;  %v669_v52 = vadd.f32 %v668_v51, %v655_v49 }
  0xcb   :  { %v712_v50 = vadd.f32 %v1233_v47, %v695_v48 }
  0xcd   :  { %v714_v53 = vmul.f32 %v712_v50, %v712_v50 }
  0xce   :  { %v682_v54 = vpop.f32.mrf.mxu2 }
  0xcf   :  { %v683_v55 = vadd.f32 %v682_v54, %v669_v52  ;;  %716 = vadd.xlane.f32.xlu0 %v714_v53  ;;  %v696_v56 = vpop.f32.mrf.mxu3 }
  0xd1   :  { %v697_v57 = vadd.f32 %v696_v56, %v683_v55 }
  0xd3   :  { %v713_v58 = vadd.f32 %v1233_v47, %v697_v57 }
  0xd5   :  { %v715_v59 = vmul.f32 %v713_v58, %v713_v58 }
  0xd7   :  { %718 = vadd.xlane.f32.xlu0 %v715_v59 }
 0x142   :  { %v717_v3 = vpop.xlane.xlu0 %716 }
 0x143   :  { %1234 = vrsqrt.f32 %v717_v3  ;;  %vm726_vm1 = vweird.f32 %v717_v3 }
 0x149   :  { %v1235_v4 = vpop.eup %1234 }
 0x14a   :  { %v721_v5 = vmul.f32 %v1235_v4, %v717_v3  ;;  %v719_v6 = vpop.xlane.xlu0 %718  ;;  %vm727_vm0 = vweird.f32 %v1235_v4 }
 0x14b   :  { %1236 = vrsqrt.f32 %v719_v6  ;;  %vm728_vm2 = vmor %vm726_vm1, %vm727_vm0  ;;  %vm736_vm4 = vweird.f32 %v719_v6 }
 0x14c   :  { %v722_v7 = vmul.f32 %v1235_v4, %v721_v5 }
 0x14e   :  { %v723_v8 = vmul.f32 0.5, %v722_v7 }
 0x150   :  { %v724_v9 = vsub.f32 1.5, %v723_v8 }
 0x151   :  { %v1237_v10 = vpop.eup %1236 }
 0x152   :  { %v725_v11 = vmul.f32 %v1235_v4, %v724_v9  ;;  %v731_v12 = vmul.f32 %v1237_v10, %v719_v6  ;;  %vm737_vm3 = vweird.f32 %v1237_v10 }
 0x153   :  { %vm738_vm5 = vmor %vm736_vm4, %vm737_vm3 }
 0x154   :  { %v729_v13 = vsel %vm728_vm2, %v1235_v4, %v725_v11  ;;  %v732_v14 = vmul.f32 %v1237_v10, %v731_v12 }
 0x155   :  { %v740_v15 = vmul.f32 %v729_v13, %v712_v50 }
 0x156   :  { %v733_v16 = vmul.f32 0.5, %v732_v14 }
 0x157   :  { %742 = vst [vmem:[%s1551_s5] sm:$0xff] %v740_v15 }
 0x158   :  { %v734_v17 = vsub.f32 1.5, %v733_v16 }
 0x15a   :  { %v735_v18 = vmul.f32 %v1237_v10, %v734_v17 }
 0x15c   :  { %v739_v19 = vsel %vm738_vm5, %v1237_v10, %v735_v18 }
 0x15d   :  { %v741_v20 = vmul.f32 %v739_v19, %v713_v58 }
 0x15f   :  { %743 = vst [vmem:[%s1551_s5 + $0x8] sm:$0xff] %v741_v20  ;;  %v744_v21 = vpack.c.bf16 %v741_v20, %v740_v15 }
 0x161   :  { %817 = vmatmul.bf16.vlgmr.msra.gmra.mxu0 %v744_v21 }
 0x1de   :  { %v818_v22 = vpop.f32.mrf.mxu0 }
 0x1df   :  { %823 = vst [vmem:[%s1552_s4] sm:$0xff] %v818_v22 }
 0x1e6   :  { %v820_v23 = vpop.f32.mrf.mxu0 }
 0x1e7   :  { %824 = vst [vmem:[%s1552_s4 + $0x8] sm:$0xff] %v820_v23 }

</bundles_post_ra>
